<compile_context>
chip_gen: v7x
topology: tpu7x:2x2x1
jax: 0.10.0
libtpu: 0.0.40
codegen_flags: <defaults>
</compile_context>

<pallas_src>
import jax
import jax.numpy as jnp
from jax.experimental import pallas as pl
from jax.experimental.pallas import tpu as pltpu


def assemble_kernel(x_ref, w_ref, b_ref, o_ref):
    # x_ref: (TB, D)       batch tile of the flattened input
    # w_ref: (D, 2*KP)     [W1 | W2], each zero-padded to KP=128 lanes
    # b_ref: (1, 2*KP)     [b1 | b2], same padding
    # o_ref: (TB, KP)      pred1 * pred2 (lane-dense, padded classes)
    kp = o_ref.shape[-1]
    # Single fused MXU pass + one bias broadcast/add.
    y = jnp.dot(x_ref[...], w_ref[...], preferred_element_type=jnp.float32)
    y = y + b_ref[...]
    pred1 = y[:, :kp]
    pred2 = y[:, kp:]
    # TODO(synk): AssembleModel.forward prints pred1/pred2/pred1*pred2 when
    # self.debug is True; host-side printing has no clean Pallas equivalent.
    o_ref[...] = (pred1 * pred2).astype(o_ref.dtype)


def assemble_model(x_nchw, w1, b1, w2, b2):
    """Pallas implementation of AssembleModel(model1, model2)(x).

    x_nchw: (B, C, H, W) float32
    w1, w2: (C*H*W, K)   float32
    b1, b2: (K,)         float32
    returns: (B, K) float32  == model1(x) * model2(x)
    """
    B = x_nchw.shape[0]
    D = x_nchw.shape[1] * x_nchw.shape[2] * x_nchw.shape[3]
    K = w1.shape[1]

    # ---- layout plumbing (plain JAX, outside the kernel) -------------------
    KP = 128                                   # lane-dense class padding
    B_pad = max(8, ((B + 7) // 8) * 8)         # sublane-dense batch padding
    TB = min(B_pad, 128)                       # batch tile (rows per grid step)
    # B_pad is a multiple of 8; make it a multiple of TB too.
    B_pad = ((B_pad + TB - 1) // TB) * TB

    x_flat = x_nchw.reshape(B, D)              # NCHW row-major flatten
    x_flat = jnp.zeros((B_pad, D), jnp.float32).at[:B, :].set(x_flat)

    # Fused, zero-padded weight / bias:  [W1 | W2] -> (D, 2*KP)
    w_cat = jnp.zeros((D, 2 * KP), jnp.float32)
    w_cat = w_cat.at[:, :K].set(w1).at[:, KP:KP + K].set(w2)
    b_cat = jnp.zeros((1, 2 * KP), jnp.float32)
    b_cat = b_cat.at[0, :K].set(b1).at[0, KP:KP + K].set(b2)

    grid_b = pl.cdiv(B_pad, TB)

    out_padded = pl.pallas_call(
        assemble_kernel,
        out_shape=jax.ShapeDtypeStruct((B_pad, KP), jnp.float32),
        grid_spec=pltpu.PrefetchScalarGridSpec(
            num_scalar_prefetch=0,
            grid=(grid_b,),
            in_specs=[
                pl.BlockSpec((TB, D), lambda i: (i, 0)),        # x batch tile
                pl.BlockSpec((D, 2 * KP), lambda i: (0, 0)),    # fused weights
                pl.BlockSpec((1, 2 * KP), lambda i: (0, 0)),    # fused bias
            ],
            out_specs=pl.BlockSpec((TB, KP), lambda i: (i, 0)),
        ),
        compiler_params=pltpu.CompilerParams(
            # Batch tiles are independent -> shard across TCs on v7x.
            dimension_semantics=("parallel",),
        ),
    )(x_flat, w_cat, b_cat)

    # Strip the batch/class padding.
    return out_padded[:B, :K]


def _reference(x_nchw, w1, b1, w2, b2):
    B = x_nchw.shape[0]
    x_flat = x_nchw.reshape(B, -1)
    pred1 = x_flat @ w1 + b1
    pred2 = x_flat @ w2 + b2
    return pred1 * pred2


if __name__ == "__main__":
    # Small shapes consistent with an NCHW image-classifier input.
    B, C, H, W = 2, 4, 16, 16
    NUM_CLASSES = 10
    D = C * H * W

    key = jax.random.PRNGKey(0)
    kx, kw1, kb1, kw2, kb2 = jax.random.split(key, 5)

    x = jax.random.normal(kx, (B, C, H, W), dtype=jnp.float32)
    # Deterministic synthetic parameters for the two sub-models.
    w1 = 0.02 * jax.random.normal(kw1, (D, NUM_CLASSES), dtype=jnp.float32)
    b1 = 0.01 * jax.random.normal(kb1, (NUM_CLASSES,), dtype=jnp.float32)
    w2 = 0.02 * jax.random.normal(kw2, (D, NUM_CLASSES), dtype=jnp.float32)
    b2 = 0.01 * jax.random.normal(kb2, (NUM_CLASSES,), dtype=jnp.float32)

    out = assemble_model(x, w1, b1, w2, b2)
    out = jax.block_until_ready(out)

    ref = _reference(x, w1, b1, w2, b2)
    assert out.shape == (B, NUM_CLASSES)
    assert jnp.allclose(out, ref, atol=1e-4, rtol=1e-4)

    print("KERNEL_OK")
</pallas_src>

<mosaic_0001>
module attributes {stable_mosaic.version = 11 : i64} {
  func.func @assemble_kernel(%arg0: i32, %arg1: memref<8x1024xf32, #tpu.memory_space<vmem>>, %arg2: memref<1024x256xf32, #tpu.memory_space<vmem>>, %arg3: memref<1x256xf32, #tpu.memory_space<vmem>>, %arg4: memref<8x128xf32, #tpu.memory_space<vmem>>) attributes {dimension_semantics = [#tpu.dimension_semantics<parallel>], iteration_bounds = array<i64: 1>, scalar_prefetch = 0 : i64, scratch_operands = 0 : i64, tpu.core_type = #tpu.core_type<tc>, window_params = [{transform_indices = @transform_0, window_bounds = array<i64: 8, 1024>}, {pipeline_mode = #tpu.pipeline_mode<synchronous>, transform_indices = @transform_1, window_bounds = array<i64: 1024, 256>}, {pipeline_mode = #tpu.pipeline_mode<synchronous>, transform_indices = @transform_2, window_bounds = array<i64: 1, 256>}, {transform_indices = @transform_3, window_bounds = array<i64: 8, 128>}]} {
    %c0 = arith.constant 0 : index
    %c0_0 = arith.constant 0 : index
    %0 = vector.load %arg1[%c0, %c0_0] : memref<8x1024xf32, #tpu.memory_space<vmem>>, vector<8x1024xf32>
    %c0_1 = arith.constant 0 : index
    %c0_2 = arith.constant 0 : index
    %1 = vector.load %arg2[%c0_1, %c0_2] : memref<1024x256xf32, #tpu.memory_space<vmem>>, vector<1024x256xf32>
    %cst = arith.constant dense<0.000000e+00> : vector<8x256xf32>
    %2 = tpu.matmul %0, %1, %cst {dimension_numbers = #tpu.dot_dimension_numbers<[1], [0], [0], [1], [0, 0, 1, 1], [], []>} : vector<8x1024xf32>, vector<1024x256xf32>, vector<8x256xf32> -> vector<8x256xf32>
    %c0_3 = arith.constant 0 : index
    %c0_4 = arith.constant 0 : index
    %3 = vector.load %arg3[%c0_3, %c0_4] : memref<1x256xf32, #tpu.memory_space<vmem>>, vector<1x256xf32>
    %4 = vector.broadcast %3 : vector<1x256xf32> to vector<8x256xf32>
    %5 = arith.addf %2, %4 : vector<8x256xf32>
    %6 = vector.extract_strided_slice %5 {offsets = [0, 0], sizes = [8, 128], strides = [1, 1]} : vector<8x256xf32> to vector<8x128xf32>
    %7 = vector.extract_strided_slice %5 {offsets = [0, 128], sizes = [8, 128], strides = [1, 1]} : vector<8x256xf32> to vector<8x128xf32>
    %8 = arith.mulf %6, %7 : vector<8x128xf32>
    %c0_5 = arith.constant 0 : index
    %c0_6 = arith.constant 0 : index
    %9 = vector.load %arg4[%c0_5, %c0_6] : memref<8x128xf32, #tpu.memory_space<vmem>>, vector<8x128xf32>
    tpu.vector_store %arg4[%c0_5, %c0_6], %8 {strides = array<i32>} : memref<8x128xf32, #tpu.memory_space<vmem>>, vector<8x128xf32>,
    return
  }
  func.func @transform_0(%arg0: i32) -> (i32, i32) {
    %c0_i32 = arith.constant 0 : i32
    %c0_i32_0 = arith.constant 0 : i32
    return %arg0, %c0_i32 : i32, i32
  }
  func.func @transform_1(%arg0: i32) -> (i32, i32) {
    %c0_i32 = arith.constant 0 : i32
    %c0_i32_0 = arith.constant 0 : i32
    %c0_i32_1 = arith.constant 0 : i32
    return %c0_i32, %c0_i32_0 : i32, i32
  }
  func.func @transform_2(%arg0: i32) -> (i32, i32) {
    %c0_i32 = arith.constant 0 : i32
    %c0_i32_0 = arith.constant 0 : i32
    %c0_i32_1 = arith.constant 0 : i32
    return %c0_i32, %c0_i32_0 : i32, i32
  }
  func.func @transform_3(%arg0: i32) -> (i32, i32) {
    %c0_i32 = arith.constant 0 : i32
    %c0_i32_0 = arith.constant 0 : i32
    return %arg0, %c0_i32 : i32, i32
  }
}

</mosaic_0001>

<bundles_post_ra>
// kernel: tpu_custom_call.1
= control target key start
LH: loop header
LB: loop body
LE: loop exit
PB: predicated region body
PF: predicated region fallthrough
CT: control target
= control target key end

     0   :  { %8 = vsyncpa [#allocation3], 0  ;;  %s1031_s0 = inlined_call_operand.hbm [shape: f32[8,1024], index: 0, kind: input, shape index: {}]   ;;  %s1032_s1 = inlined_call_operand.hbm [shape: f32[1024,256], index: 1, kind: input, shape index: {}]   ;;  %s1033_s2 = inlined_call_operand.vmem [shape: f32[1,256], index: 2, kind: input, shape index: {}]   ;;  %s1034_s3 = inlined_call_operand.hbm [shape: f32[8,128], index: 3, kind: output, shape index: {}]  }
   0x1   :  { %9 = vsyncpa [#allocation6], 0 }
   0x2   :  { %10 = vsyncpa [#allocation4], 0  ;;  %s960_s12 = smov [#allocation2]   ;;  %s961_s14 = smov [#allocation5]  }
   0x3   :  { %s17_s13 = sshll.u32 %s960_s12, 4  ;;  %s26_s15 = sshll.u32 %s961_s14, 4  ;;  %s18_s13 = int_to_ptr.vmem [resolvable:$true] %s17_s13  ;;  %s985_s15 = int_to_ptr.vmem [resolvable:$true] %s26_s15 }
   0x4   :  { %s888_s18 = scalar_lea.hbm %s1031_s0, 1024 }
   0x5   :  { %p889_p0 = scmp.ne.s32.totalorder %s1031_s0, %s888_s18  ;;  %p892_p1 = scmp.lt.u32.totalorder %s888_s18, %s1031_s0 }
   0x7   :  { %p894_p2 = pnand %p892_p1, %p889_p0 }
   0x9   :  { %897 = shalt.err (!%p894_p2)
}
   0xa   :  { %s898_s23 = scalar_lea.vmem %s18_s13, 1024  ;;  %p903_p4 = scmp.lt.s32.totalorder %s18_s13, %s18_s13 }
   0xb   :  { %p899_p3 = scmp.ne.s32.totalorder %s18_s13, %s898_s23  ;;  %p904_p5 = scmp.lt.s32.totalorder %s898_s23, %s898_s23 }
   0xd   :  { %p905_p6 = por %p904_p5, %p903_p4 }
   0xf   :  { %p906_p7 = pnand %p905_p6, %p899_p3 }
  0x11   :  { %909 = shalt.err (!%p906_p7)
}
  0x12   :  { %20 = dma.hbm_to_vmem [thread:$0]  %s1031_s0, 1024, %s18_s13, [#allocation3]  }
  0x13   :  { %s910_s28 = scalar_lea.hbm %s1032_s1, 32768 }
  0x14   :  { %p911_p8 = scmp.ne.s32.totalorder %s1032_s1, %s910_s28  ;;  %p914_p9 = scmp.lt.u32.totalorder %s910_s28, %s1032_s1 }
  0x16   :  { %p916_p10 = pnand %p914_p9, %p911_p8 }
  0x18   :  { %919 = shalt.err (!%p916_p10)
}
  0x19   :  { %s920_s6 = scalar_lea.vmem %s985_s15, 32768  ;;  %p925_p12 = scmp.lt.s32.totalorder %s985_s15, %s985_s15 }
  0x1a   :  { %p921_p11 = scmp.ne.s32.totalorder %s985_s15, %s920_s6  ;;  %p926_p13 = scmp.lt.s32.totalorder %s920_s6, %s920_s6 }
  0x1c   :  { %p927_p0 = por %p926_p13, %p925_p12 }
  0x1e   :  { %p928_p1 = pnand %p927_p0, %p921_p11 }
  0x20   :  { %931 = shalt.err (!%p928_p1)
}
  0x21   :  { %s962_s0 = smov 256   ;;  %s963_s7 = smov 16  }
  0x22   :  { %32 = dma.hbm_to_vmem [thread:$0]  %s1032_s1, 32768, %s985_s15, [#allocation6], %s962_s0, %s962_s0, %s963_s7  }
  0x23   :  { %954 = dma.done.wait [#allocation3], 1024  }
  0x24   :  { %955 = vsyncadd [#allocation3], 4294966272 }
  0x25   :  { %956 = dma.done.wait [#allocation6], 32768  }
  0x26   :  { %957 = vsyncadd [#allocation6], 4294934528  ;;  %v50_v0 = vld [vmem:[#allocation5 + $0x8] sm:$0xff]  ;;  %v52_v1 = vld [vmem:[#allocation5 + $0x18] sm:$0xff]  ;;  %s964_s11 = smov [#allocation7]  }
  0x27   :  { %v178_v2 = vld [vmem:[#allocation5 + $0x408] sm:$0xff]  ;;  %v619_v3 = vpack.c.bf16 %v52_v1, %v50_v0  ;;  %v180_v4 = vld [vmem:[#allocation5 + $0x418] sm:$0xff]  ;;  %v49_v5 = vld [vmem:[#allocation5] sm:$0xff]  ;;  %s609_s12 = sshll.u32 %s964_s11, 4  ;;  %s610_s12 = int_to_ptr.vmem [resolvable:$true] %s609_s12 }
  0x28   :  { %v51_v6 = vld [vmem:[#allocation5 + $0x10] sm:$0xff]  ;;  %v747_v7 = vpack.c.bf16 %v180_v4, %v178_v2  ;;  %v177_v9 = vld [vmem:[#allocation5 + $0x400] sm:$0xff]  ;;  %v54_v11 = vld [vmem:[#allocation5 + $0x28] sm:$0xff]  ;;  %s932_s13 = scalar_lea.vmem %s610_s12, 128  ;;  %p937_p3 = scmp.lt.s32.totalorder %s610_s12, %s610_s12 }
  0x29   :  { %v621_v8 = vpack.c.bf16 %v51_v6, %v49_v5  ;;  %v179_v10 = vld [vmem:[#allocation5 + $0x410] sm:$0xff]  ;;  %620 = vmatprep.subr.bf16.mxu1 %v619_v3  ;;  %v56_v13 = vld [vmem:[#allocation5 + $0x38] sm:$0xff]  ;;  %v182_v14 = vld [vmem:[#allocation5 + $0x428] sm:$0xff]  ;;  %p933_p2 = scmp.ne.s32.totalorder %s610_s12, %s932_s13  ;;  %p938_p4 = scmp.lt.s32.totalorder %s932_s13, %s932_s13 }
  0x2a   :  { %v749_v12 = vpack.c.bf16 %v179_v10, %v177_v9  ;;  %v184_v15 = vld [vmem:[#allocation5 + $0x438] sm:$0xff]  ;;  %748 = vmatprep.subr.bf16.mxu0 %v747_v7  ;;  %v623_v16 = vpack.c.bf16 %v56_v13, %v54_v11  ;;  %v53_v18 = vld [vmem:[#allocation5 + $0x20] sm:$0xff]  ;;  %v55_v19 = vld [vmem:[#allocation5 + $0x30] sm:$0xff] }
  0x2b   :  { %622 = vmatpush1.bf16.msra.mxu1 %v621_v8  ;;  %v751_v17 = vpack.c.bf16 %v184_v15, %v182_v14  ;;  %v181_v20 = vld [vmem:[#allocation5 + $0x420] sm:$0xff]  ;;  %v625_v21 = vpack.c.bf16 %v55_v19, %v53_v18  ;;  %v183_v22 = vld [vmem:[#allocation5 + $0x430] sm:$0xff]  ;;  %v58_v23 = vld [vmem:[#allocation5 + $0x48] sm:$0xff]  ;;  %p939_p5 = por %p938_p4, %p937_p3 }
  0x2c   :  { %750 = vmatpush1.bf16.msra.mxu0 %v749_v12  ;;  %v60_v24 = vld [vmem:[#allocation5 + $0x58] sm:$0xff]  ;;  %624 = vmatprep.subr.bf16.mxu1 %v623_v16  ;;  %v753_v25 = vpack.c.bf16 %v183_v22, %v181_v20  ;;  %v186_v27 = vld [vmem:[#allocation5 + $0x448] sm:$0xff]  ;;  %v57_v29 = vld [vmem:[#allocation5 + $0x40] sm:$0xff] }
  0x2d   :  { %752 = vmatprep.subr.bf16.mxu0 %v751_v17  ;;  %v627_v26 = vpack.c.bf16 %v60_v24, %v58_v23  ;;  %v188_v28 = vld [vmem:[#allocation5 + $0x458] sm:$0xff]  ;;  %v59_v31 = vld [vmem:[#allocation5 + $0x50] sm:$0xff]  ;;  %v185_v32 = vld [vmem:[#allocation5 + $0x440] sm:$0xff]  ;;  %p940_p6 = pnand %p939_p5, %p933_p2 }
  0x2e   :  { %v755_v30 = vpack.c.bf16 %v188_v28, %v186_v27  ;;  %v187_v33 = vld [vmem:[#allocation5 + $0x450] sm:$0xff]  ;;  %v629_v34 = vpack.c.bf16 %v59_v31, %v57_v29  ;;  %v62_v35 = vld [vmem:[#allocation5 + $0x68] sm:$0xff]  ;;  %v64_v36 = vld [vmem:[#allocation5 + $0x78] sm:$0xff] }
  0x2f   :  { %626 = vmatpush1.bf16.msra.mxu1 %v625_v21  ;;  %v190_v37 = vld [vmem:[#allocation5 + $0x468] sm:$0xff]  ;;  %v757_v38 = vpack.c.bf16 %v187_v33, %v185_v32  ;;  %v631_v39 = vpack.c.bf16 %v64_v36, %v62_v35  ;;  %v192_v40 = vld [vmem:[#allocation5 + $0x478] sm:$0xff]  ;;  %v61_v41 = vld [vmem:[#allocation5 + $0x60] sm:$0xff] }
  0x30   :  { %754 = vmatpush1.bf16.msra.mxu0 %v753_v25  ;;  %628 = vmatprep.subr.bf16.mxu1 %v627_v26  ;;  %v63_v42 = vld [vmem:[#allocation5 + $0x70] sm:$0xff]  ;;  %v759_v43 = vpack.c.bf16 %v192_v40, %v190_v37  ;;  %v189_v44 = vld [vmem:[#allocation5 + $0x460] sm:$0xff]  ;;  %v66_v46 = vld [vmem:[#allocation5 + $0x88] sm:$0xff] }
  0x31   :  { %756 = vmatprep.subr.bf16.mxu0 %v755_v30  ;;  %v191_v45 = vld [vmem:[#allocation5 + $0x470] sm:$0xff]  ;;  %v68_v47 = vld [vmem:[#allocation5 + $0x98] sm:$0xff]  ;;  %v194_v48 = vld [vmem:[#allocation5 + $0x488] sm:$0xff]  ;;  %v633_v50 = vpack.c.bf16 %v63_v42, %v61_v41 }
  0x32   :  { %v196_v49 = vld [vmem:[#allocation5 + $0x498] sm:$0xff]  ;;  %v761_v51 = vpack.c.bf16 %v191_v45, %v189_v44  ;;  %v635_v52 = vpack.c.bf16 %v68_v47, %v66_v46  ;;  %v65_v53 = vld [vmem:[#allocation5 + $0x80] sm:$0xff]  ;;  %v67_v54 = vld [vmem:[#allocation5 + $0x90] sm:$0xff] }
  0x33   :  { %630 = vmatpush1.bf16.msra.mxu1 %v629_v34  ;;  %v193_v55 = vld [vmem:[#allocation5 + $0x480] sm:$0xff]  ;;  %v763_v56 = vpack.c.bf16 %v196_v49, %v194_v48  ;;  %v195_v57 = vld [vmem:[#allocation5 + $0x490] sm:$0xff]  ;;  %v70_v58 = vld [vmem:[#allocation5 + $0xa8] sm:$0xff]  ;;  %v637_v62 = vpack.c.bf16 %v67_v54, %v65_v53 }
  0x34   :  { %758 = vmatpush1.bf16.msra.mxu0 %v757_v38  ;;  %632 = vmatprep.subr.bf16.mxu1 %v631_v39  ;;  %v72_v59 = vld [vmem:[#allocation5 + $0xb8] sm:$0xff]  ;;  %v198_v60 = vld [vmem:[#allocation5 + $0x4a8] sm:$0xff]  ;;  %v765_v63 = vpack.c.bf16 %v195_v57, %v193_v55  ;;  %v69_v1 = vld [vmem:[#allocation5 + $0xa0] sm:$0xff] }
  0x35   :  { %760 = vmatprep.subr.bf16.mxu0 %v759_v43  ;;  %v200_v61 = vld [vmem:[#allocation5 + $0x4b8] sm:$0xff]  ;;  %v639_v0 = vpack.c.bf16 %v72_v59, %v70_v58  ;;  %v71_v2 = vld [vmem:[#allocation5 + $0xb0] sm:$0xff]  ;;  %v197_v3 = vld [vmem:[#allocation5 + $0x4a0] sm:$0xff] }
  0x36   :  { %v767_v4 = vpack.c.bf16 %v200_v61, %v198_v60  ;;  %v199_v5 = vld [vmem:[#allocation5 + $0x4b0] sm:$0xff]  ;;  %v74_v6 = vld [vmem:[#allocation5 + $0xc8] sm:$0xff]  ;;  %v76_v7 = vld [vmem:[#allocation5 + $0xd8] sm:$0xff]  ;;  %v641_v10 = vpack.c.bf16 %v71_v2, %v69_v1 }
  0x37   :  { %634 = vmatpush1.bf16.msra.mxu1 %v633_v50  ;;  %v202_v8 = vld [vmem:[#allocation5 + $0x4c8] sm:$0xff]  ;;  %v204_v9 = vld [vmem:[#allocation5 + $0x4d8] sm:$0xff]  ;;  %v769_v11 = vpack.c.bf16 %v199_v5, %v197_v3  ;;  %v643_v12 = vpack.c.bf16 %v76_v7, %v74_v6  ;;  %v73_v13 = vld [vmem:[#allocation5 + $0xc0] sm:$0xff] }
  0x38   :  { %762 = vmatpush1.bf16.msra.mxu0 %v761_v51  ;;  %636 = vmatprep.subr.bf16.mxu1 %v635_v52  ;;  %v75_v14 = vld [vmem:[#allocation5 + $0xd0] sm:$0xff]  ;;  %v201_v15 = vld [vmem:[#allocation5 + $0x4c0] sm:$0xff]  ;;  %v771_v16 = vpack.c.bf16 %v204_v9, %v202_v8  ;;  %v78_v18 = vld [vmem:[#allocation5 + $0xe8] sm:$0xff] }
  0x39   :  { %764 = vmatprep.subr.bf16.mxu0 %v763_v56  ;;  %v203_v17 = vld [vmem:[#allocation5 + $0x4d0] sm:$0xff]  ;;  %v80_v19 = vld [vmem:[#allocation5 + $0xf8] sm:$0xff]  ;;  %v206_v20 = vld [vmem:[#allocation5 + $0x4e8] sm:$0xff]  ;;  %v645_v22 = vpack.c.bf16 %v75_v14, %v73_v13 }
  0x3a   :  { %v208_v21 = vld [vmem:[#allocation5 + $0x4f8] sm:$0xff]  ;;  %v773_v23 = vpack.c.bf16 %v203_v17, %v201_v15  ;;  %v647_v24 = vpack.c.bf16 %v80_v19, %v78_v18  ;;  %v77_v25 = vld [vmem:[#allocation5 + $0xe0] sm:$0xff]  ;;  %v79_v26 = vld [vmem:[#allocation5 + $0xf0] sm:$0xff] }
  0x3b   :  { %638 = vmatpush1.bf16.msra.mxu1 %v637_v62  ;;  %v205_v27 = vld [vmem:[#allocation5 + $0x4e0] sm:$0xff]  ;;  %v775_v28 = vpack.c.bf16 %v208_v21, %v206_v20  ;;  %v207_v29 = vld [vmem:[#allocation5 + $0x4f0] sm:$0xff]  ;;  %v82_v30 = vld [vmem:[#allocation5 + $0x108] sm:$0xff]  ;;  %v649_v34 = vpack.c.bf16 %v79_v26, %v77_v25 }
  0x3c   :  { %766 = vmatpush1.bf16.msra.mxu0 %v765_v63  ;;  %640 = vmatprep.subr.bf16.mxu1 %v639_v0  ;;  %v84_v31 = vld [vmem:[#allocation5 + $0x118] sm:$0xff]  ;;  %v210_v32 = vld [vmem:[#allocation5 + $0x508] sm:$0xff]  ;;  %v777_v35 = vpack.c.bf16 %v207_v29, %v205_v27  ;;  %v81_v37 = vld [vmem:[#allocation5 + $0x100] sm:$0xff] }
  0x3d   :  { %768 = vmatprep.subr.bf16.mxu0 %v767_v4  ;;  %v212_v33 = vld [vmem:[#allocation5 + $0x518] sm:$0xff]  ;;  %v651_v36 = vpack.c.bf16 %v84_v31, %v82_v30  ;;  %v83_v38 = vld [vmem:[#allocation5 + $0x110] sm:$0xff]  ;;  %v209_v39 = vld [vmem:[#allocation5 + $0x500] sm:$0xff] }
  0x3e   :  { %v779_v40 = vpack.c.bf16 %v212_v33, %v210_v32  ;;  %v211_v41 = vld [vmem:[#allocation5 + $0x510] sm:$0xff]  ;;  %v86_v42 = vld [vmem:[#allocation5 + $0x128] sm:$0xff]  ;;  %v88_v43 = vld [vmem:[#allocation5 + $0x138] sm:$0xff]  ;;  %v653_v46 = vpack.c.bf16 %v83_v38, %v81_v37 }
  0x3f   :  { %642 = vmatpush1.bf16.msra.mxu1 %v641_v10  ;;  %v214_v44 = vld [vmem:[#allocation5 + $0x528] sm:$0xff]  ;;  %v216_v45 = vld [vmem:[#allocation5 + $0x538] sm:$0xff]  ;;  %v781_v47 = vpack.c.bf16 %v211_v41, %v209_v39  ;;  %v655_v48 = vpack.c.bf16 %v88_v43, %v86_v42  ;;  %v85_v49 = vld [vmem:[#allocation5 + $0x120] sm:$0xff] }
  0x40   :  { %770 = vmatpush1.bf16.msra.mxu0 %v769_v11  ;;  %644 = vmatprep.subr.bf16.mxu1 %v643_v12  ;;  %v87_v50 = vld [vmem:[#allocation5 + $0x130] sm:$0xff]  ;;  %v213_v51 = vld [vmem:[#allocation5 + $0x520] sm:$0xff]  ;;  %v783_v52 = vpack.c.bf16 %v216_v45, %v214_v44  ;;  %v90_v54 = vld [vmem:[#allocation5 + $0x148] sm:$0xff] }
  0x41   :  { %772 = vmatprep.subr.bf16.mxu0 %v771_v16  ;;  %v215_v53 = vld [vmem:[#allocation5 + $0x530] sm:$0xff]  ;;  %v92_v55 = vld [vmem:[#allocation5 + $0x158] sm:$0xff]  ;;  %v218_v56 = vld [vmem:[#allocation5 + $0x548] sm:$0xff]  ;;  %v657_v58 = vpack.c.bf16 %v87_v50, %v85_v49 }
  0x42   :  { %v220_v57 = vld [vmem:[#allocation5 + $0x558] sm:$0xff]  ;;  %v785_v59 = vpack.c.bf16 %v215_v53, %v213_v51  ;;  %v659_v60 = vpack.c.bf16 %v92_v55, %v90_v54  ;;  %v89_v61 = vld [vmem:[#allocation5 + $0x140] sm:$0xff]  ;;  %v91_v62 = vld [vmem:[#allocation5 + $0x150] sm:$0xff] }
  0x43   :  { %646 = vmatpush1.bf16.msra.mxu1 %v645_v22  ;;  %v217_v63 = vld [vmem:[#allocation5 + $0x540] sm:$0xff]  ;;  %v787_v0 = vpack.c.bf16 %v220_v57, %v218_v56  ;;  %v219_v1 = vld [vmem:[#allocation5 + $0x550] sm:$0xff]  ;;  %v94_v2 = vld [vmem:[#allocation5 + $0x168] sm:$0xff]  ;;  %v661_v6 = vpack.c.bf16 %v91_v62, %v89_v61 }
  0x44   :  { %774 = vmatpush1.bf16.msra.mxu0 %v773_v23  ;;  %648 = vmatprep.subr.bf16.mxu1 %v647_v24  ;;  %v96_v3 = vld [vmem:[#allocation5 + $0x178] sm:$0xff]  ;;  %v222_v4 = vld [vmem:[#allocation5 + $0x568] sm:$0xff]  ;;  %v93_v7 = vld [vmem:[#allocation5 + $0x160] sm:$0xff]  ;;  %v789_v8 = vpack.c.bf16 %v219_v1, %v217_v63 }
  0x45   :  { %776 = vmatprep.subr.bf16.mxu0 %v775_v28  ;;  %v224_v5 = vld [vmem:[#allocation5 + $0x578] sm:$0xff]  ;;  %v663_v9 = vpack.c.bf16 %v96_v3, %v94_v2  ;;  %v95_v10 = vld [vmem:[#allocation5 + $0x170] sm:$0xff]  ;;  %v221_v11 = vld [vmem:[#allocation5 + $0x560] sm:$0xff] }
  0x46   :  { %v223_v12 = vld [vmem:[#allocation5 + $0x570] sm:$0xff]  ;;  %v791_v13 = vpack.c.bf16 %v224_v5, %v222_v4  ;;  %v98_v14 = vld [vmem:[#allocation5 + $0x188] sm:$0xff]  ;;  %v100_v15 = vld [vmem:[#allocation5 + $0x198] sm:$0xff]  ;;  %v665_v20 = vpack.c.bf16 %v95_v10, %v93_v7 }
  0x47   :  { %650 = vmatpush1.bf16.msra.mxu1 %v649_v34  ;;  %v42_v16 = vld [vmem:[#allocation2 + $0x8] sm:$0xff]  ;;  %v228_v18 = vld [vmem:[#allocation5 + $0x598] sm:$0xff]  ;;  %v793_v21 = vpack.c.bf16 %v223_v12, %v221_v11  ;;  %v667_v22 = vpack.c.bf16 %v100_v15, %v98_v14  ;;  %v97_v23 = vld [vmem:[#allocation5 + $0x180] sm:$0xff] }
  0x48   :  { %778 = vmatpush1.bf16.msra.mxu0 %v777_v35  ;;  %652 = vmatprep.subr.bf16.mxu1 %v651_v36  ;;  %v226_v17 = vld [vmem:[#allocation5 + $0x588] sm:$0xff]  ;;  %v99_v24 = vld [vmem:[#allocation5 + $0x190] sm:$0xff]  ;;  %v225_v25 = vld [vmem:[#allocation5 + $0x580] sm:$0xff] }
  0x49   :  { %780 = vmatprep.subr.bf16.mxu0 %v779_v40  ;;  %381 = vmatprep.mubr.f32.mxu1 %v42_v16  ;;  %v46_v19 = vld [vmem:[#allocation2 + $0x28] sm:$0xff]  ;;  %v795_v26 = vpack.c.bf16 %v228_v18, %v226_v17  ;;  %v227_v27 = vld [vmem:[#allocation5 + $0x590] sm:$0xff]  ;;  %v104_v29 = vld [vmem:[#allocation5 + $0x1b8] sm:$0xff]  ;;  %v669_v32 = vpack.c.bf16 %v99_v24, %v97_v23 }
  0x4a   :  { %523 = vmatprep.mubr.f32.mxu0 %v46_v19  ;;  %v102_v28 = vld [vmem:[#allocation5 + $0x1a8] sm:$0xff]  ;;  %v232_v31 = vld [vmem:[#allocation5 + $0x5b8] sm:$0xff]  ;;  %v797_v33 = vpack.c.bf16 %v227_v27, %v225_v25  ;;  %v101_v35 = vld [vmem:[#allocation5 + $0x1a0] sm:$0xff] }
  0x4b   :  { %654 = vmatpush1.bf16.msra.mxu1 %v653_v46  ;;  %v230_v30 = vld [vmem:[#allocation5 + $0x5a8] sm:$0xff]  ;;  %v671_v34 = vpack.c.bf16 %v104_v29, %v102_v28  ;;  %v103_v36 = vld [vmem:[#allocation5 + $0x1b0] sm:$0xff]  ;;  %v229_v37 = vld [vmem:[#allocation5 + $0x5a0] sm:$0xff] }
  0x4c   :  { %782 = vmatpush1.bf16.msra.mxu0 %v781_v47  ;;  %656 = vmatprep.subr.bf16.mxu1 %v655_v48  ;;  %v799_v38 = vpack.c.bf16 %v232_v31, %v230_v30  ;;  %v231_v39 = vld [vmem:[#allocation5 + $0x5b0] sm:$0xff]  ;;  %v106_v40 = vld [vmem:[#allocation5 + $0x1c8] sm:$0xff]  ;;  %v108_v41 = vld [vmem:[#allocation5 + $0x1d8] sm:$0xff]  ;;  %v673_v44 = vpack.c.bf16 %v103_v36, %v101_v35 }
  0x4d   :  { %784 = vmatprep.subr.bf16.mxu0 %v783_v52  ;;  %v234_v42 = vld [vmem:[#allocation5 + $0x5c8] sm:$0xff]  ;;  %v236_v43 = vld [vmem:[#allocation5 + $0x5d8] sm:$0xff]  ;;  %v801_v45 = vpack.c.bf16 %v231_v39, %v229_v37  ;;  %v675_v46 = vpack.c.bf16 %v108_v41, %v106_v40  ;;  %v105_v47 = vld [vmem:[#allocation5 + $0x1c0] sm:$0xff] }
  0x4e   :  { %v107_v48 = vld [vmem:[#allocation5 + $0x1d0] sm:$0xff]  ;;  %v233_v49 = vld [vmem:[#allocation5 + $0x5c0] sm:$0xff]  ;;  %v803_v50 = vpack.c.bf16 %v236_v43, %v234_v42  ;;  %v110_v52 = vld [vmem:[#allocation5 + $0x1e8] sm:$0xff] }
  0x4f   :  { %658 = vmatpush1.bf16.msra.mxu1 %v657_v58  ;;  %v235_v51 = vld [vmem:[#allocation5 + $0x5d0] sm:$0xff]  ;;  %v112_v53 = vld [vmem:[#allocation5 + $0x1f8] sm:$0xff]  ;;  %v238_v54 = vld [vmem:[#allocation5 + $0x5e8] sm:$0xff]  ;;  %v677_v56 = vpack.c.bf16 %v107_v48, %v105_v47 }
  0x50   :  { %786 = vmatpush1.bf16.msra.mxu0 %v785_v59  ;;  %660 = vmatprep.subr.bf16.mxu1 %v659_v60  ;;  %v240_v55 = vld [vmem:[#allocation5 + $0x5f8] sm:$0xff]  ;;  %v805_v57 = vpack.c.bf16 %v235_v51, %v233_v49  ;;  %v679_v58 = vpack.c.bf16 %v112_v53, %v110_v52  ;;  %v109_v59 = vld [vmem:[#allocation5 + $0x1e0] sm:$0xff]  ;;  %v111_v60 = vld [vmem:[#allocation5 + $0x1f0] sm:$0xff] }
  0x51   :  { %788 = vmatprep.subr.bf16.mxu0 %v787_v0  ;;  %v237_v61 = vld [vmem:[#allocation5 + $0x5e0] sm:$0xff]  ;;  %v807_v62 = vpack.c.bf16 %v240_v55, %v238_v54  ;;  %v239_v63 = vld [vmem:[#allocation5 + $0x5f0] sm:$0xff]  ;;  %v114_v0 = vld [vmem:[#allocation5 + $0x208] sm:$0xff]  ;;  %v681_v4 = vpack.c.bf16 %v111_v60, %v109_v59 }
  0x52   :  { %v116_v1 = vld [vmem:[#allocation5 + $0x218] sm:$0xff]  ;;  %v242_v2 = vld [vmem:[#allocation5 + $0x608] sm:$0xff]  ;;  %v809_v5 = vpack.c.bf16 %v239_v63, %v237_v61  ;;  %v113_v7 = vld [vmem:[#allocation5 + $0x200] sm:$0xff] }
  0x53   :  { %662 = vmatpush1.bf16.msra.mxu1 %v661_v6  ;;  %v244_v3 = vld [vmem:[#allocation5 + $0x618] sm:$0xff]  ;;  %v683_v6 = vpack.c.bf16 %v116_v1, %v114_v0  ;;  %v243_v11 = vld [vmem:[#allocation5 + $0x610] sm:$0xff]  ;;  %v118_v12 = vld [vmem:[#allocation5 + $0x228] sm:$0xff] }
  0x54   :  { %790 = vmatpush1.bf16.msra.mxu0 %v789_v8  ;;  %664 = vmatprep.subr.bf16.mxu1 %v663_v9  ;;  %v115_v8 = vld [vmem:[#allocation5 + $0x210] sm:$0xff]  ;;  %v241_v9 = vld [vmem:[#allocation5 + $0x600] sm:$0xff]  ;;  %v811_v10 = vpack.c.bf16 %v244_v3, %v242_v2  ;;  %v246_v14 = vld [vmem:[#allocation5 + $0x628] sm:$0xff] }
  0x55   :  { %792 = vmatprep.subr.bf16.mxu0 %v791_v13  ;;  %v120_v13 = vld [vmem:[#allocation5 + $0x238] sm:$0xff]  ;;  %v41_v16 = vld [vmem:[#allocation2] sm:$0xff]  ;;  %v685_v17 = vpack.c.bf16 %v115_v8, %v113_v7  ;;  %v813_v19 = vpack.c.bf16 %v243_v11, %v241_v9  ;;  %v247_v25 = vld [vmem:[#allocation5 + $0x630] sm:$0xff] }
  0x56   :  { %v248_v15 = vld [vmem:[#allocation5 + $0x638] sm:$0xff]  ;;  %v45_v18 = vld [vmem:[#allocation2 + $0x20] sm:$0xff]  ;;  %v250_v28 = vld [vmem:[#allocation5 + $0x648] sm:$0xff] }
  0x57   :  { %666 = vmatpush1.bf16.msra.mxu1 %v665_v20  ;;  %v687_v20 = vpack.c.bf16 %v120_v13, %v118_v12  ;;  %v245_v23 = vld [vmem:[#allocation5 + $0x620] sm:$0xff]  ;;  %v815_v24 = vpack.c.bf16 %v248_v15, %v246_v14  ;;  %v124_v27 = vld [vmem:[#allocation5 + $0x258] sm:$0xff]  ;;  %v251_v37 = vld [vmem:[#allocation5 + $0x650] sm:$0xff] }
  0x58   :  { %794 = vmatpush1.bf16.msra.mxu0 %v793_v21  ;;  %668 = vmatprep.subr.bf16.mxu1 %v667_v22  ;;  %v117_v21 = vld [vmem:[#allocation5 + $0x220] sm:$0xff]  ;;  %v119_v22 = vld [vmem:[#allocation5 + $0x230] sm:$0xff]  ;;  %v252_v29 = vld [vmem:[#allocation5 + $0x658] sm:$0xff]  ;;  %v817_v31 = vpack.c.bf16 %v247_v25, %v245_v23 }
  0x59   :  { %796 = vmatprep.subr.bf16.mxu0 %v795_v26  ;;  %v122_v26 = vld [vmem:[#allocation5 + $0x248] sm:$0xff]  ;;  %v689_v30 = vpack.c.bf16 %v119_v22, %v117_v21  ;;  %v249_v35 = vld [vmem:[#allocation5 + $0x640] sm:$0xff]  ;;  %v819_v36 = vpack.c.bf16 %v252_v29, %v250_v28  ;;  %v128_v39 = vld [vmem:[#allocation5 + $0x278] sm:$0xff] }
  0x5a   :  { %v254_v40 = vld [vmem:[#allocation5 + $0x668] sm:$0xff]  ;;  %v256_v41 = vld [vmem:[#allocation5 + $0x678] sm:$0xff]  ;;  %v821_v43 = vpack.c.bf16 %v251_v37, %v249_v35  ;;  %v253_v47 = vld [vmem:[#allocation5 + $0x660] sm:$0xff] }
  0x5b   :  { %670 = vmatpush1.bf16.msra.mxu1 %v669_v32  ;;  %v691_v32 = vpack.c.bf16 %v124_v27, %v122_v26  ;;  %v823_v48 = vpack.c.bf16 %v256_v41, %v254_v40  ;;  %v255_v49 = vld [vmem:[#allocation5 + $0x670] sm:$0xff]  ;;  %v132_v51 = vld [vmem:[#allocation5 + $0x298] sm:$0xff]  ;;  %v258_v52 = vld [vmem:[#allocation5 + $0x688] sm:$0xff] }
  0x5c   :  { %798 = vmatpush1.bf16.msra.mxu0 %v797_v33  ;;  %672 = vmatprep.subr.bf16.mxu1 %v671_v34  ;;  %v121_v33 = vld [vmem:[#allocation5 + $0x240] sm:$0xff]  ;;  %v123_v34 = vld [vmem:[#allocation5 + $0x250] sm:$0xff]  ;;  %v260_v53 = vld [vmem:[#allocation5 + $0x698] sm:$0xff]  ;;  %v825_v55 = vpack.c.bf16 %v255_v49, %v253_v47 }
  0x5d   :  { %800 = vmatprep.subr.bf16.mxu0 %v799_v38  ;;  %v126_v38 = vld [vmem:[#allocation5 + $0x268] sm:$0xff]  ;;  %v693_v42 = vpack.c.bf16 %v123_v34, %v121_v33  ;;  %v257_v59 = vld [vmem:[#allocation5 + $0x680] sm:$0xff]  ;;  %v827_v60 = vpack.c.bf16 %v260_v53, %v258_v52  ;;  %v259_v61 = vld [vmem:[#allocation5 + $0x690] sm:$0xff] }
  0x5e   :  { %v136_v63 = vld [vmem:[#allocation5 + $0x2b8] sm:$0xff]  ;;  %v262_v0 = vld [vmem:[#allocation5 + $0x6a8] sm:$0xff]  ;;  %v829_v3 = vpack.c.bf16 %v259_v61, %v257_v59  ;;  %v261_v7 = vld [vmem:[#allocation5 + $0x6a0] sm:$0xff] }
  0x5f   :  { %674 = vmatpush1.bf16.msra.mxu1 %v673_v44  ;;  %v695_v44 = vpack.c.bf16 %v128_v39, %v126_v38  ;;  %v264_v1 = vld [vmem:[#allocation5 + $0x6b8] sm:$0xff]  ;;  %v263_v9 = vld [vmem:[#allocation5 + $0x6b0] sm:$0xff]  ;;  %v266_v12 = vld [vmem:[#allocation5 + $0x6c8] sm:$0xff] }
  0x60   :  { %802 = vmatpush1.bf16.msra.mxu0 %v801_v45  ;;  %676 = vmatprep.subr.bf16.mxu1 %v675_v46  ;;  %v125_v45 = vld [vmem:[#allocation5 + $0x260] sm:$0xff]  ;;  %v127_v46 = vld [vmem:[#allocation5 + $0x270] sm:$0xff]  ;;  %v831_v8 = vpack.c.bf16 %v264_v1, %v262_v0  ;;  %v140_v11 = vld [vmem:[#allocation5 + $0x2d8] sm:$0xff] }
  0x61   :  { %804 = vmatprep.subr.bf16.mxu0 %v803_v50  ;;  %v130_v50 = vld [vmem:[#allocation5 + $0x288] sm:$0xff]  ;;  %v697_v54 = vpack.c.bf16 %v127_v46, %v125_v45  ;;  %v268_v13 = vld [vmem:[#allocation5 + $0x6d8] sm:$0xff]  ;;  %v137_v15 = vld [vmem:[#allocation5 + $0x2c0] sm:$0xff] }
  0x62   :  { %v835_v21 = vpack.c.bf16 %v268_v13, %v266_v12  ;;  %v142_v22 = vld [vmem:[#allocation5 + $0x2e8] sm:$0xff]  ;;  %v144_v23 = vld [vmem:[#allocation5 + $0x2f8] sm:$0xff]  ;;  %v269_v33 = vld [vmem:[#allocation5 + $0x6e0] sm:$0xff] }
  0x63   :  { %678 = vmatpush1.bf16.msra.mxu1 %v677_v56  ;;  %v699_v56 = vpack.c.bf16 %v132_v51, %v130_v50  ;;  %v270_v25 = vld [vmem:[#allocation5 + $0x6e8] sm:$0xff]  ;;  %v272_v26 = vld [vmem:[#allocation5 + $0x6f8] sm:$0xff]  ;;  %v271_v35 = vld [vmem:[#allocation5 + $0x6f0] sm:$0xff] }
  0x64   :  { %806 = vmatpush1.bf16.msra.mxu0 %v805_v57  ;;  %680 = vmatprep.subr.bf16.mxu1 %v679_v58  ;;  %v129_v57 = vld [vmem:[#allocation5 + $0x280] sm:$0xff]  ;;  %v131_v58 = vld [vmem:[#allocation5 + $0x290] sm:$0xff]  ;;  %v48_v27 = vld [vmem:[#allocation2 + $0x38] sm:$0xff]  ;;  %v839_v34 = vpack.c.bf16 %v272_v26, %v270_v25  ;;  %v841_v41 = vpack.c.bf16 %v271_v35, %v269_v33 }
  0x65   :  { %808 = vmatprep.subr.bf16.mxu0 %v807_v62  ;;  %v134_v62 = vld [vmem:[#allocation5 + $0x2a8] sm:$0xff]  ;;  %v701_v2 = vpack.c.bf16 %v131_v58, %v129_v57  ;;  %v148_v37 = vld [vmem:[#allocation5 + $0x318] sm:$0xff]  ;;  %v273_v45 = vld [vmem:[#allocation5 + $0x700] sm:$0xff] }
  0x66   :  { %v274_v38 = vld [vmem:[#allocation5 + $0x708] sm:$0xff]  ;;  %v276_v39 = vld [vmem:[#allocation5 + $0x718] sm:$0xff]  ;;  %v275_v47 = vld [vmem:[#allocation5 + $0x710] sm:$0xff] }
  0x67   :  { %682 = vmatpush1.bf16.msra.mxu1 %v681_v4  ;;  %v703_v4 = vpack.c.bf16 %v136_v63, %v134_v62  ;;  %v843_v46 = vpack.c.bf16 %v276_v39, %v274_v38  ;;  %v152_v49 = vld [vmem:[#allocation5 + $0x338] sm:$0xff]  ;;  %v278_v50 = vld [vmem:[#allocation5 + $0x728] sm:$0xff]  ;;  %v845_v53 = vpack.c.bf16 %v275_v47, %v273_v45  ;;  %v277_v57 = vld [vmem:[#allocation5 + $0x720] sm:$0xff] }
  0x68   :  { %810 = vmatpush1.bf16.msra.mxu0 %v809_v5  ;;  %684 = vmatprep.subr.bf16.mxu1 %v683_v6  ;;  %v133_v5 = vld [vmem:[#allocation5 + $0x2a0] sm:$0xff]  ;;  %v135_v6 = vld [vmem:[#allocation5 + $0x2b0] sm:$0xff]  ;;  %v280_v51 = vld [vmem:[#allocation5 + $0x738] sm:$0xff] }
  0x69   :  { %812 = vmatprep.subr.bf16.mxu0 %v811_v10  ;;  %v138_v10 = vld [vmem:[#allocation5 + $0x2c8] sm:$0xff]  ;;  %v705_v14 = vpack.c.bf16 %v135_v6, %v133_v5  ;;  %v847_v58 = vpack.c.bf16 %v280_v51, %v278_v50  ;;  %v279_v59 = vld [vmem:[#allocation5 + $0x730] sm:$0xff]  ;;  %v156_v61 = vld [vmem:[#allocation5 + $0x358] sm:$0xff] }
  0x6a   :  { %382 = vmatmul.mubr.f32.vlgmr.msra.gmra.mrb[0].mxu1 %v41_v16  ;;  %v833_v16 = vpack.c.bf16 %v263_v9, %v261_v7  ;;  %v282_v62 = vld [vmem:[#allocation5 + $0x748] sm:$0xff]  ;;  %v284_v63 = vld [vmem:[#allocation5 + $0x758] sm:$0xff]  ;;  %v849_v1 = vpack.c.bf16 %v279_v59, %v277_v57  ;;  %v281_v5 = vld [vmem:[#allocation5 + $0x740] sm:$0xff] }
  0x6b   :  { %686 = vmatpush1.bf16.msra.mxu1 %v685_v17  ;;  %524 = vmatmul.mubr.f32.vlgmr.msra.gmra.mrb[0].mxu0 %v45_v18  ;;  %v707_v17 = vpack.c.bf16 %v140_v11, %v138_v10  ;;  %v139_v18 = vld [vmem:[#allocation5 + $0x2d0] sm:$0xff]  ;;  %v851_v6 = vpack.c.bf16 %v284_v63, %v282_v62  ;;  %v160_v9 = vld [vmem:[#allocation5 + $0x378] sm:$0xff]  ;;  %v286_v10 = vld [vmem:[#allocation5 + $0x768] sm:$0xff] }
  0x6c   :  { %814 = vmatpush1.bf16.msra.mxu0 %v813_v19  ;;  %688 = vmatprep.subr.bf16.mxu1 %v687_v20  ;;  %v265_v19 = vld [vmem:[#allocation5 + $0x6c0] sm:$0xff]  ;;  %v267_v20 = vld [vmem:[#allocation5 + $0x6d0] sm:$0xff]  ;;  %v709_v28 = vpack.c.bf16 %v139_v18, %v137_v15  ;;  %v288_v11 = vld [vmem:[#allocation5 + $0x778] sm:$0xff] }
  0x6d   :  { %816 = vmatprep.subr.bf16.mxu0 %v815_v24  ;;  %v44_v24 = vld [vmem:[#allocation2 + $0x18] sm:$0xff]  ;;  %594 = vmatprep.mubr.f32.mxu0 %v48_v27  ;;  %v837_v29 = vpack.c.bf16 %v267_v20, %v265_v19  ;;  %v283_v7 = vld [vmem:[#allocation5 + $0x750] sm:$0xff]  ;;  %v157_v15 = vld [vmem:[#allocation5 + $0x360] sm:$0xff]  ;;  %v855_v18 = vpack.c.bf16 %v288_v11, %v286_v10 }
  0x6e   :  { %452 = vmatprep.mubr.f32.mxu1 %v44_v24  ;;  %v853_v13 = vpack.c.bf16 %v283_v7, %v281_v5  ;;  %v287_v19 = vld [vmem:[#allocation5 + $0x770] sm:$0xff]  ;;  %v162_v20 = vld [vmem:[#allocation5 + $0x388] sm:$0xff]  ;;  %v161_v27 = vld [vmem:[#allocation5 + $0x380] sm:$0xff] }
  0x6f   :  { %690 = vmatpush1.bf16.msra.mxu1 %v689_v30  ;;  %v711_v30 = vpack.c.bf16 %v144_v23, %v142_v22  ;;  %v290_v22 = vld [vmem:[#allocation5 + $0x788] sm:$0xff]  ;;  %v292_v23 = vld [vmem:[#allocation5 + $0x798] sm:$0xff]  ;;  %v165_v39 = vld [vmem:[#allocation5 + $0x3a0] sm:$0xff] }
  0x70   :  { %818 = vmatpush1.bf16.msra.mxu0 %v817_v31  ;;  %692 = vmatprep.subr.bf16.mxu1 %v691_v32  ;;  %v141_v31 = vld [vmem:[#allocation5 + $0x2e0] sm:$0xff]  ;;  %v143_v32 = vld [vmem:[#allocation5 + $0x2f0] sm:$0xff]  ;;  %v168_v33 = vld [vmem:[#allocation5 + $0x3b8] sm:$0xff] }
  0x71   :  { %820 = vmatprep.subr.bf16.mxu0 %v819_v36  ;;  %v146_v36 = vld [vmem:[#allocation5 + $0x308] sm:$0xff]  ;;  %v713_v40 = vpack.c.bf16 %v143_v32, %v141_v31  ;;  %v291_v31 = vld [vmem:[#allocation5 + $0x790] sm:$0xff]  ;;  %v296_v35 = vld [vmem:[#allocation5 + $0x7b8] sm:$0xff] }
  0x72   :  { %v166_v32 = vld [vmem:[#allocation5 + $0x3a8] sm:$0xff]  ;;  %v172_v45 = vld [vmem:[#allocation5 + $0x3d8] sm:$0xff]  ;;  %v169_v51 = vld [vmem:[#allocation5 + $0x3c0] sm:$0xff] }
  0x73   :  { %694 = vmatpush1.bf16.msra.mxu1 %v693_v42  ;;  %v715_v42 = vpack.c.bf16 %v148_v37, %v146_v36  ;;  %v735_v38 = vpack.c.bf16 %v168_v33, %v166_v32  ;;  %v300_v47 = vld [vmem:[#allocation5 + $0x7d8] sm:$0xff]  ;;  %v173_v63 = vld [vmem:[#allocation5 + $0x3e0] sm:$0xff]  ;;  %v47_v7 = vld [vmem:[#allocation2 + $0x30] sm:$0xff] }
  0x74   :  { %822 = vmatpush1.bf16.msra.mxu0 %v821_v43  ;;  %696 = vmatprep.subr.bf16.mxu1 %v695_v44  ;;  %v145_v43 = vld [vmem:[#allocation5 + $0x300] sm:$0xff]  ;;  %v147_v44 = vld [vmem:[#allocation5 + $0x310] sm:$0xff]  ;;  %v176_v57 = vld [vmem:[#allocation5 + $0x3f8] sm:$0xff] }
  0x75   :  { %824 = vmatprep.subr.bf16.mxu0 %v823_v48  ;;  %v150_v48 = vld [vmem:[#allocation5 + $0x328] sm:$0xff]  ;;  %v717_v52 = vpack.c.bf16 %v147_v44, %v145_v43  ;;  %v295_v43 = vld [vmem:[#allocation5 + $0x7b0] sm:$0xff]  ;;  %v304_v59 = vld [vmem:[#allocation5 + $0x7f8] sm:$0xff] }
  0x76   :  { %v170_v44 = vld [vmem:[#allocation5 + $0x3c8] sm:$0xff]  ;;  %v305_v11 = vld [vmem:[%s1033_s2] sm:$0x3] }
  0x77   :  { %698 = vmatpush1.bf16.msra.mxu1 %v697_v54  ;;  %v719_v54 = vpack.c.bf16 %v152_v49, %v150_v48  ;;  %v739_v50 = vpack.c.bf16 %v172_v45, %v170_v44 }
  0x78   :  { %826 = vmatpush1.bf16.msra.mxu0 %v825_v55  ;;  %700 = vmatprep.subr.bf16.mxu1 %v699_v56  ;;  %v149_v55 = vld [vmem:[#allocation5 + $0x320] sm:$0xff]  ;;  %v151_v56 = vld [vmem:[#allocation5 + $0x330] sm:$0xff] }
  0x79   :  { %828 = vmatprep.subr.bf16.mxu0 %v827_v60  ;;  %v154_v60 = vld [vmem:[#allocation5 + $0x348] sm:$0xff]  ;;  %v721_v0 = vpack.c.bf16 %v151_v56, %v149_v55  ;;  %v299_v55 = vld [vmem:[#allocation5 + $0x7d0] sm:$0xff] }
  0x7a   :  { %v174_v56 = vld [vmem:[#allocation5 + $0x3e8] sm:$0xff] }
  0x7b   :  { %702 = vmatpush1.bf16.msra.mxu1 %v701_v2  ;;  %v723_v2 = vpack.c.bf16 %v156_v61, %v154_v60  ;;  %v743_v62 = vpack.c.bf16 %v176_v57, %v174_v56 }
  0x7c   :  { %830 = vmatpush1.bf16.msra.mxu0 %v829_v3  ;;  %704 = vmatprep.subr.bf16.mxu1 %v703_v4  ;;  %v153_v3 = vld [vmem:[#allocation5 + $0x340] sm:$0xff]  ;;  %v155_v4 = vld [vmem:[#allocation5 + $0x350] sm:$0xff] }
  0x7d   :  { %832 = vmatprep.subr.bf16.mxu0 %v831_v8  ;;  %v158_v8 = vld [vmem:[#allocation5 + $0x368] sm:$0xff]  ;;  %v725_v12 = vpack.c.bf16 %v155_v4, %v153_v3  ;;  %v303_v3 = vld [vmem:[#allocation5 + $0x7f0] sm:$0xff] }
  0x7f   :  { %706 = vmatpush1.bf16.msra.mxu1 %v705_v14  ;;  %v727_v14 = vpack.c.bf16 %v160_v9, %v158_v8  ;;  %v307_v8 = vlaneseq }
  0x80   :  { %834 = vmatpush1.bf16.msra.mxu0 %v833_v16  ;;  %708 = vmatprep.subr.bf16.mxu1 %v707_v17  ;;  %v159_v16 = vld [vmem:[#allocation5 + $0x370] sm:$0xff]  ;;  %v285_v17 = vld [vmem:[#allocation5 + $0x760] sm:$0xff] }
  0x81   :  { %836 = vmatprep.subr.bf16.mxu0 %v835_v21  ;;  %v164_v21 = vld [vmem:[#allocation5 + $0x398] sm:$0xff]  ;;  %v729_v24 = vpack.c.bf16 %v159_v16, %v157_v15  ;;  %v857_v25 = vpack.c.bf16 %v287_v19, %v285_v17  ;;  %v308_v9 = vshrl.u32 %v307_v8, 7 }
  0x82   :  { %v731_v26 = vpack.c.bf16 %v164_v21, %v162_v20 }
  0x83   :  { %710 = vmatpush1.bf16.msra.mxu1 %v709_v28  ;;  %v163_v28 = vld [vmem:[#allocation5 + $0x390] sm:$0xff]  ;;  %v309_v10 = vsub.s32 0, %v308_v9 }
  0x84   :  { %838 = vmatpush1.bf16.msra.mxu0 %v837_v29  ;;  %712 = vmatprep.subr.bf16.mxu1 %v711_v30  ;;  %v289_v29 = vld [vmem:[#allocation5 + $0x780] sm:$0xff]  ;;  %v859_v30 = vpack.c.bf16 %v292_v23, %v290_v22  ;;  %v733_v36 = vpack.c.bf16 %v163_v28, %v161_v27 }
  0x85   :  { %840 = vmatprep.subr.bf16.mxu0 %v839_v34  ;;  %v294_v34 = vld [vmem:[#allocation5 + $0x7a8] sm:$0xff]  ;;  %v861_v37 = vpack.c.bf16 %v291_v31, %v289_v29 }
  0x87   :  { %714 = vmatpush1.bf16.msra.mxu1 %v713_v40  ;;  %v167_v40 = vld [vmem:[#allocation5 + $0x3b0] sm:$0xff] }
  0x88   :  { %842 = vmatpush1.bf16.msra.mxu0 %v841_v41  ;;  %716 = vmatprep.subr.bf16.mxu1 %v715_v42  ;;  %v293_v41 = vld [vmem:[#allocation5 + $0x7a0] sm:$0xff]  ;;  %v863_v42 = vpack.c.bf16 %v296_v35, %v294_v34  ;;  %v737_v48 = vpack.c.bf16 %v167_v40, %v165_v39 }
  0x89   :  { %844 = vmatprep.subr.bf16.mxu0 %v843_v46  ;;  %v298_v46 = vld [vmem:[#allocation5 + $0x7c8] sm:$0xff]  ;;  %v865_v49 = vpack.c.bf16 %v295_v43, %v293_v41 }
  0x8b   :  { %718 = vmatpush1.bf16.msra.mxu1 %v717_v52  ;;  %v171_v52 = vld [vmem:[#allocation5 + $0x3d0] sm:$0xff] }
  0x8c   :  { %846 = vmatpush1.bf16.msra.mxu0 %v845_v53  ;;  %720 = vmatprep.subr.bf16.mxu1 %v719_v54  ;;  %v297_v53 = vld [vmem:[#allocation5 + $0x7c0] sm:$0xff]  ;;  %v867_v54 = vpack.c.bf16 %v300_v47, %v298_v46  ;;  %v741_v60 = vpack.c.bf16 %v171_v52, %v169_v51 }
  0x8d   :  { %848 = vmatprep.subr.bf16.mxu0 %v847_v58  ;;  %v302_v58 = vld [vmem:[#allocation5 + $0x7e8] sm:$0xff]  ;;  %v869_v61 = vpack.c.bf16 %v299_v55, %v297_v53 }
  0x8f   :  { %722 = vmatpush1.bf16.msra.mxu1 %v721_v0  ;;  %v175_v0 = vld [vmem:[#allocation5 + $0x3f0] sm:$0xff] }
  0x90   :  { %850 = vmatpush1.bf16.msra.mxu0 %v849_v1  ;;  %724 = vmatprep.subr.bf16.mxu1 %v723_v2  ;;  %v871_v1 = vpack.c.bf16 %v304_v59, %v302_v58  ;;  %v301_v2 = vld [vmem:[#allocation5 + $0x7e0] sm:$0xff]  ;;  %v745_v4 = vpack.c.bf16 %v175_v0, %v173_v63 }
  0x91   :  { %852 = vmatprep.subr.bf16.mxu0 %v851_v6  ;;  %v873_v5 = vpack.c.bf16 %v303_v3, %v301_v2  ;;  %v43_v6 = vld [vmem:[#allocation2 + $0x10] sm:$0xff] }
  0x93   :  { %726 = vmatpush1.bf16.msra.mxu1 %v725_v12  ;;  %v313_v12 = vsub.s32 1, %v308_v9 }
  0x94   :  { %854 = vmatpush1.bf16.msra.mxu0 %v853_v13  ;;  %728 = vmatprep.subr.bf16.mxu1 %v727_v14  ;;  %v310_v13 = vrot.slane %v305_v11, %v309_v10 }
  0x95   :  { %856 = vmatprep.subr.bf16.mxu0 %v855_v18  ;;  %v314_v14 = vrot.slane %v305_v11, %v313_v12 }
  0x97   :  { %730 = vmatpush1.bf16.msra.mxu1 %v729_v24 }
  0x98   :  { %858 = vmatpush1.bf16.msra.mxu0 %v857_v25  ;;  %732 = vmatprep.subr.bf16.mxu1 %v731_v26 }
  0x99   :  { %860 = vmatprep.subr.bf16.mxu0 %v859_v30 }
  0x9b   :  { %734 = vmatpush1.bf16.msra.mxu1 %v733_v36 }
  0x9c   :  { %862 = vmatpush1.bf16.msra.mxu0 %v861_v37  ;;  %736 = vmatprep.subr.bf16.mxu1 %v735_v38 }
  0x9d   :  { %864 = vmatprep.subr.bf16.mxu0 %v863_v42 }
  0x9f   :  { %738 = vmatpush1.bf16.msra.mxu1 %v737_v48 }
  0xa0   :  { %866 = vmatpush1.bf16.msra.mxu0 %v865_v49  ;;  %740 = vmatprep.subr.bf16.mxu1 %v739_v50 }
  0xa1   :  { %868 = vmatprep.subr.bf16.mxu0 %v867_v54 }
  0xa3   :  { %742 = vmatpush1.bf16.msra.mxu1 %v741_v60 }
  0xa4   :  { %870 = vmatpush1.bf16.msra.mxu0 %v869_v61  ;;  %744 = vmatprep.subr.bf16.mxu1 %v743_v62 }
  0xa5   :  { %872 = vmatprep.subr.bf16.mxu0 %v871_v1 }
  0xa7   :  { %746 = vmatpush1.bf16.msra.mxu1 %v745_v4 }
  0xa8   :  { %874 = vmatpush1.bf16.msra.mxu0 %v873_v5 }
  0xaa   :  { %453 = vmatmul.mubr.f32.vlgmr.msra.gmra.mrb[0].mxu1 %v43_v6 }
  0xab   :  { %595 = vmatmul.mubr.f32.vlgmr.msra.gmra.mrb[0].mxu0 %v47_v7 }
 0x17d   :  { %v454_v15 = vpop.f32.mrb[0].mxu1 }
 0x17e   :  { %v875_v16 = vadd.f32 %v454_v15, %v310_v13  ;;  %v596_v17 = vpop.f32.mrb[0].mxu0  ;;  %v456_v18 = vpop.f32.mrb[1].mxu1 }
 0x17f   :  { %v877_v19 = vadd.f32 %v456_v18, %v314_v14  ;;  %v598_v20 = vpop.f32.mrb[1].mxu0 }
 0x180   :  { %v876_v21 = vadd.f32 %v875_v16, %v596_v17 }
 0x181   :  { %v878_v22 = vadd.f32 %v877_v19, %v598_v20 }
 0x183   :  { %v601_v23 = vmul.f32 %v878_v22, %v876_v21 }
 0x185   :  { %602 = vst [vmem:[#allocation7] sm:$0xff] %v601_v23 }
 0x186   :  { %943 = shalt.err (!%p940_p6)
}
 0x187   :  { %s944_s15 = scalar_lea.hbm %s1034_s3, 128 }
 0x188   :  { %p945_p7 = scmp.ne.s32.totalorder %s1034_s3, %s944_s15  ;;  %p948_p8 = scmp.lt.u32.totalorder %s944_s15, %s1034_s3 }
 0x18a   :  { %p950_p9 = pnand %p948_p8, %p945_p7 }
 0x18c   :  { %953 = shalt.err (!%p950_p9)
}
 0x18d   :  { %612 = dma.vmem_to_hbm [thread:$0]  %s610_s12, 128, %s1034_s3, [#allocation4]  }
 0x18e   :  { %958 = dma.done.wait [#allocation4], 128  }
 0x18f   :  { %959 = vsyncadd [#allocation4], 4294967168 }
 0x190   :  { %616 = vsyncpa [#allocation3], 1 }
 0x191   :  { %617 = vsyncpa [#allocation6], 1 }
 0x192   :  { %618 = vsyncpa [#allocation4], 1 }

</bundles_post_ra>
